<compile_context>
chip_gen: v5e
topology: v5e:2x2
jax: 0.10.0
libtpu: 0.0.40
codegen_flags: <defaults>
</compile_context>

<pallas_src>
import jax
import jax.numpy as jnp
from jax.experimental import pallas as pl
from jax.experimental.pallas import tpu as pltpu

HIDDEN_DIM = 128   # self.hidden_dim1
OUT_DIM = 1        # self.hidden_dim2 (per head)


def _round_up(x, m):
    return (x + m - 1) // m * m


def _rep2mut_kernel(a_ref,                      # SMEM [2]: PReLU slopes a1, a2
                    wt_x_ref, mt_x_ref,         # [TB, D]     compute dtype
                    w_wt_ref, b_wt_ref,         # [D, H] cd,  [1, H] f32
                    w_mt_ref, b_mt_ref,         # [D, H] cd,  [1, H] f32
                    w_out_t_ref, b_out_t_ref,   # [NH8, H] cd,[NH8, 1] f32
                    o_ref):                     # [NH8, TB] f32 (transposed out)
    # wt branch: Linear + PReLU (f32 accumulation on the MXU)
    wt_h = jnp.dot(wt_x_ref[...], w_wt_ref[...],
                   preferred_element_type=jnp.float32) + b_wt_ref[...]
    wt_h = jnp.where(wt_h >= 0, wt_h, a_ref[0] * wt_h)

    # mt branch: Linear + PReLU
    mt_h = jnp.dot(mt_x_ref[...], w_mt_ref[...],
                   preferred_element_type=jnp.float32) + b_mt_ref[...]
    mt_h = jnp.where(mt_h >= 0, mt_h, a_ref[1] * mt_h)

    # elementwise product + all output heads fused, computed transposed so the
    # batch lands on the lane axis of the (tiny) output block:
    #   y^T[j, b] = sum_h w_out[h, j] * prod[b, h]
    prod = (wt_h * mt_h).astype(w_out_t_ref.dtype)
    y_t = jax.lax.dot_general(
        w_out_t_ref[...], prod,
        dimension_numbers=(((1,), (1,)), ((), ())),
        preferred_element_type=jnp.float32) + b_out_t_ref[...]
    o_ref[...] = y_t.astype(o_ref.dtype)


def _vmem_budget_bytes():
    cap = 64 * 2**20  # conservative fallback == v7x per-TensorCore VMEM
    try:
        info = pltpu.get_tpu_info()
        cap = int(getattr(info, "vmem_capacity_bytes", cap))
    except Exception:
        pass
    return (cap * 3) // 4   # ~48 MiB on v7x, ~96 MiB on v5e/v6e


def _auto_tile_b(D, nh8, compute_dtype, max_tile_b, vmem_budget):
    isz = jnp.dtype(compute_dtype).itemsize
    # tile-independent residency: weights/biases, counted double-buffered since
    # constant-index blocks default to 2-deep pipelining, plus compiler slack.
    fixed = 2 * (2 * D * HIDDEN_DIM * isz + nh8 * HIDDEN_DIM * isz
                 + 2 * HIDDEN_DIM * 4 + nh8 * 4) + (2 << 20)
    # per batch-row residency: double-buffered input tiles + output tile +
    # f32 intermediates (wt_h, mt_h) + product in compute dtype.
    per_row = (4 * D * isz + 2 * nh8 * 4
               + 3 * HIDDEN_DIM * 4 + HIDDEN_DIM * isz)
    tile = max(0, vmem_budget - fixed) // per_row
    tile = max(128, min(int(tile), int(max_tile_b)))
    return (tile // 128) * 128


def rep2mut_forward(wt_x, mt_x, params, heads=None, *, max_tile_b=4096,
                    compute_dtype=jnp.bfloat16):
    """Fused Pallas implementation of Rep2Mut.forward for all output heads.

    Returns {head_name: [B, 1] float32}, computed with a single pallas_call.
    """
    B, D = wt_x.shape
    assert mt_x.shape == (B, D)

    if heads is None:
        heads = tuple(params['outputs'].keys())
    heads = tuple(heads)
    n_heads = len(heads)
    nh8 = _round_up(max(n_heads, 1), 8)       # sublane-rounded head axis

    vmem_budget = _vmem_budget_bytes()
    tile_b = _auto_tile_b(D, nh8, compute_dtype, max_tile_b, vmem_budget)

    b128 = _round_up(B, 128)
    tile_b = min(tile_b, b128)
    if b128 >= 2 * 128:
        # keep >= 2 grid steps so the "parallel" batch axis can shard across
        # TensorCores on multi-core chips (v7x); free on v5e/v6e.
        tile_b = min(tile_b, _round_up(pl.cdiv(b128, 2), 128))
    tile_b = max(128, tile_b)
    b_pad = _round_up(B, tile_b)
    grid = (b_pad // tile_b,)

    w_wt, b_wt = params['wt_linear1']          # [D, H], [1, H]
    w_mt, b_mt = params['mt_linear1']          # [D, H], [1, H]
    a1a2 = jnp.concatenate(
        [params['act1'], params['act2']]).astype(jnp.float32)   # [2]

    # Fuse the per-head [H, 1] weights and transpose into one [nh8, H] matrix
    # so the kernel can emit a transposed, lane-dense [nh8, tile_b] output.
    w_cat = jnp.concatenate([params['outputs'][h][0] for h in heads], axis=1)  # [H, nh]
    b_cat = jnp.concatenate([params['outputs'][h][1] for h in heads], axis=1)  # [1, nh]
    pad_h = nh8 - n_heads
    w_out_t = jnp.pad(w_cat.T, ((0, pad_h), (0, 0))).astype(compute_dtype)     # [nh8, H]
    b_out_t = jnp.pad(b_cat.T, ((0, pad_h), (0, 0))).astype(jnp.float32)       # [nh8, 1]

    # Zero-pad the batch (padded rows/cols are sliced off after the call).
    pad_b = b_pad - B
    wt_xp = jnp.pad(wt_x.astype(compute_dtype), ((0, pad_b), (0, 0)))
    mt_xp = jnp.pad(mt_x.astype(compute_dtype), ((0, pad_b), (0, 0)))

    out_t = pl.pallas_call(
        _rep2mut_kernel,
        out_shape=jax.ShapeDtypeStruct((nh8, b_pad), jnp.float32),
        grid_spec=pltpu.PrefetchScalarGridSpec(
            num_scalar_prefetch=0,
            grid=grid,
            in_specs=[
                pl.BlockSpec(memory_space=pltpu.MemorySpace.SMEM),     # a1, a2
                pl.BlockSpec((tile_b, D), lambda i: (i, 0)),           # wt_x
                pl.BlockSpec((tile_b, D), lambda i: (i, 0)),           # mt_x
                pl.BlockSpec((D, HIDDEN_DIM), lambda i: (0, 0)),       # w_wt
                pl.BlockSpec((1, HIDDEN_DIM), lambda i: (0, 0)),       # b_wt
                pl.BlockSpec((D, HIDDEN_DIM), lambda i: (0, 0)),       # w_mt
                pl.BlockSpec((1, HIDDEN_DIM), lambda i: (0, 0)),       # b_mt
                pl.BlockSpec((nh8, HIDDEN_DIM), lambda i: (0, 0)),     # w_out^T
                pl.BlockSpec((nh8, 1), lambda i: (0, 0)),              # b_out^T
            ],
            out_specs=pl.BlockSpec((nh8, tile_b), lambda i: (0, i)),
        ),
        compiler_params=pltpu.CompilerParams(
            dimension_semantics=("parallel",),
            vmem_limit_bytes=int(vmem_budget)),
    )(a1a2, wt_xp, mt_xp,
      w_wt.astype(compute_dtype), b_wt.astype(jnp.float32),
      w_mt.astype(compute_dtype), b_mt.astype(jnp.float32),
      w_out_t, b_out_t)

    results = {}
    for j, h in enumerate(heads):
        y = out_t[j, :B].reshape(B, OUT_DIM)
        if h == 'Tat':
            y = jax.nn.sigmoid(y)     # only the 'Tat' head passes through sigmoid
        results[h] = y
    return results


def _reference_forward(wt_x, mt_x, params, heads, compute_dtype=jnp.bfloat16):
    """Plain-JAX reference with the same bf16-in / f32-accumulate casting."""
    w_wt, b_wt = params['wt_linear1']
    w_mt, b_mt = params['mt_linear1']
    a1 = params['act1'][0]
    a2 = params['act2'][0]

    wt_h = jnp.dot(wt_x.astype(compute_dtype), w_wt.astype(compute_dtype),
                   preferred_element_type=jnp.float32) + b_wt
    wt_h = jnp.where(wt_h >= 0, wt_h, a1 * wt_h)
    mt_h = jnp.dot(mt_x.astype(compute_dtype), w_mt.astype(compute_dtype),
                   preferred_element_type=jnp.float32) + b_mt
    mt_h = jnp.where(mt_h >= 0, mt_h, a2 * mt_h)
    prod = (wt_h * mt_h).astype(compute_dtype)

    results = {}
    for h in heads:
        w_o, b_o = params['outputs'][h]
        y = jnp.dot(prod, w_o.astype(compute_dtype),
                    preferred_element_type=jnp.float32) + b_o
        if h == 'Tat':
            y = jax.nn.sigmoid(y)
        results[h] = y
    return results


def init_params(key, input_dim, outputs=('0',)):
    """Deterministic init matching the shapes in Rep2Mut.__init__ (float32)."""
    def linear_init(k, fan_in, fan_out):
        kw, kb = jax.random.split(k)
        bound = 1.0 / jnp.sqrt(fan_in)
        w = jax.random.uniform(kw, (fan_in, fan_out), jnp.float32, -bound, bound)
        b = jax.random.uniform(kb, (1, fan_out), jnp.float32, -bound, bound)
        return w, b

    k_wt, k_mt, k_out = jax.random.split(key, 3)
    params = {
        'wt_linear1': linear_init(k_wt, input_dim, HIDDEN_DIM),
        'mt_linear1': linear_init(k_mt, input_dim, HIDDEN_DIM),
        'act1': jnp.array([0.25], jnp.float32),   # PReLU default slope
        'act2': jnp.array([0.25], jnp.float32),
        'outputs': {},
    }
    out_keys = jax.random.split(k_out, len(outputs))
    for name, k in zip(outputs, out_keys):
        params['outputs'][name] = linear_init(k, HIDDEN_DIM, OUT_DIM)
    return params


if __name__ == "__main__":
    key = jax.random.PRNGKey(0)
    k_params, k_wt, k_mt, k_wt2, k_mt2 = jax.random.split(key, 5)

    D = 32
    output_heads = ('0', 'Tat')
    params = init_params(k_params, D, output_heads)

    ok = True

    # Case 1: small batch (single padded 128-row tile, grid of 1).
    B1 = 20
    wt_x = jax.random.normal(k_wt, (B1, D), jnp.float32)
    mt_x = jax.random.normal(k_mt, (B1, D), jnp.float32)
    y_ref = _reference_forward(wt_x, mt_x, params, output_heads)
    y = rep2mut_forward(wt_x, mt_x, params, output_heads)
    jax.block_until_ready(y)
    for head in output_heads:
        yh = y[head]
        if yh.shape != (B1, OUT_DIM) or not jnp.allclose(
                yh, y_ref[head], atol=1e-4, rtol=1e-4):
            ok = False

    # Case 2: batch not a multiple of the tile, tile capped at 128 so the grid
    # has several steps (exercises batch padding, pipelining, megacore split).
    B2 = 300
    wt_x2 = jax.random.normal(k_wt2, (B2, D), jnp.float32)
    mt_x2 = jax.random.normal(k_mt2, (B2, D), jnp.float32)
    y_ref2 = _reference_forward(wt_x2, mt_x2, params, output_heads)
    y2 = rep2mut_forward(wt_x2, mt_x2, params, output_heads, max_tile_b=128)
    jax.block_until_ready(y2)
    for head in output_heads:
        yh = y2[head]
        if yh.shape != (B2, OUT_DIM) or not jnp.allclose(
                yh, y_ref2[head], atol=1e-4, rtol=1e-4):
            ok = False

    if ok:
        print("KERNEL_OK")
</pallas_src>

<mosaic_0001>
module attributes {stable_mosaic.version = 11 : i64} {
  func.func @_rep2mut_kernel(%arg0: i32, %arg1: memref<2xf32, #tpu.memory_space<smem>>, %arg2: memref<128x32xbf16, #tpu.memory_space<vmem>>, %arg3: memref<128x32xbf16, #tpu.memory_space<vmem>>, %arg4: memref<32x128xbf16, #tpu.memory_space<vmem>>, %arg5: memref<1x128xf32, #tpu.memory_space<vmem>>, %arg6: memref<32x128xbf16, #tpu.memory_space<vmem>>, %arg7: memref<1x128xf32, #tpu.memory_space<vmem>>, %arg8: memref<8x128xbf16, #tpu.memory_space<vmem>>, %arg9: memref<8x1xf32, #tpu.memory_space<vmem>>, %arg10: memref<8x128xf32, #tpu.memory_space<vmem>>) attributes {dimension_semantics = [#tpu.dimension_semantics<parallel>], iteration_bounds = array<i64: 1>, scalar_prefetch = 0 : i64, scratch_operands = 0 : i64, tpu.core_type = #tpu.core_type<tc>, window_params = [{transform_indices = @transform_0, window_bounds = array<i64: 2>}, {transform_indices = @transform_1, window_bounds = array<i64: 128, 32>}, {transform_indices = @transform_2, window_bounds = array<i64: 128, 32>}, {pipeline_mode = #tpu.pipeline_mode<synchronous>, transform_indices = @transform_3, window_bounds = array<i64: 32, 128>}, {pipeline_mode = #tpu.pipeline_mode<synchronous>, transform_indices = @transform_4, window_bounds = array<i64: 1, 128>}, {pipeline_mode = #tpu.pipeline_mode<synchronous>, transform_indices = @transform_5, window_bounds = array<i64: 32, 128>}, {pipeline_mode = #tpu.pipeline_mode<synchronous>, transform_indices = @transform_6, window_bounds = array<i64: 1, 128>}, {pipeline_mode = #tpu.pipeline_mode<synchronous>, transform_indices = @transform_7, window_bounds = array<i64: 8, 128>}, {pipeline_mode = #tpu.pipeline_mode<synchronous>, transform_indices = @transform_8, window_bounds = array<i64: 8, 1>}, {transform_indices = @transform_9, window_bounds = array<i64: 8, 128>}]} {
    %c0 = arith.constant 0 : index
    %c0_0 = arith.constant 0 : index
    %0 = vector.load %arg2[%c0, %c0_0] : memref<128x32xbf16, #tpu.memory_space<vmem>>, vector<128x32xbf16>
    %c0_1 = arith.constant 0 : index
    %c0_2 = arith.constant 0 : index
    %1 = vector.load %arg4[%c0_1, %c0_2] : memref<32x128xbf16, #tpu.memory_space<vmem>>, vector<32x128xbf16>
    %cst = arith.constant dense<0.000000e+00> : vector<128x128xf32>
    %2 = tpu.matmul %0, %1, %cst {dimension_numbers = #tpu.dot_dimension_numbers<[1], [0], [0], [1], [0, 0, 1, 1], [], []>} : vector<128x32xbf16>, vector<32x128xbf16>, vector<128x128xf32> -> vector<128x128xf32>
    %c0_3 = arith.constant 0 : index
    %c0_4 = arith.constant 0 : index
    %3 = vector.load %arg5[%c0_3, %c0_4] : memref<1x128xf32, #tpu.memory_space<vmem>>, vector<1x128xf32>
    %4 = vector.broadcast %3 : vector<1x128xf32> to vector<128x128xf32>
    %5 = arith.addf %2, %4 : vector<128x128xf32>
    %cst_5 = arith.constant 0.000000e+00 : f32
    %6 = vector.broadcast %cst_5 : f32 to vector<128x128xf32>
    %7 = arith.cmpf oge, %5, %6 : vector<128x128xf32>
    %c0_6 = arith.constant 0 : index
    %8 = memref.load %arg1[%c0_6] : memref<2xf32, #tpu.memory_space<smem>>
    %9 = vector.broadcast %8 : f32 to vector<128x128xf32>
    %10 = arith.mulf %9, %5 : vector<128x128xf32>
    %11 = arith.select %7, %5, %10 : vector<128x128xi1>, vector<128x128xf32>
    %c0_7 = arith.constant 0 : index
    %c0_8 = arith.constant 0 : index
    %12 = vector.load %arg3[%c0_7, %c0_8] : memref<128x32xbf16, #tpu.memory_space<vmem>>, vector<128x32xbf16>
    %c0_9 = arith.constant 0 : index
    %c0_10 = arith.constant 0 : index
    %13 = vector.load %arg6[%c0_9, %c0_10] : memref<32x128xbf16, #tpu.memory_space<vmem>>, vector<32x128xbf16>
    %cst_11 = arith.constant dense<0.000000e+00> : vector<128x128xf32>
    %14 = tpu.matmul %12, %13, %cst_11 {dimension_numbers = #tpu.dot_dimension_numbers<[1], [0], [0], [1], [0, 0, 1, 1], [], []>} : vector<128x32xbf16>, vector<32x128xbf16>, vector<128x128xf32> -> vector<128x128xf32>
    %c0_12 = arith.constant 0 : index
    %c0_13 = arith.constant 0 : index
    %15 = vector.load %arg7[%c0_12, %c0_13] : memref<1x128xf32, #tpu.memory_space<vmem>>, vector<1x128xf32>
    %16 = vector.broadcast %15 : vector<1x128xf32> to vector<128x128xf32>
    %17 = arith.addf %14, %16 : vector<128x128xf32>
    %cst_14 = arith.constant 0.000000e+00 : f32
    %18 = vector.broadcast %cst_14 : f32 to vector<128x128xf32>
    %19 = arith.cmpf oge, %17, %18 : vector<128x128xf32>
    %c1 = arith.constant 1 : index
    %20 = memref.load %arg1[%c1] : memref<2xf32, #tpu.memory_space<smem>>
    %21 = vector.broadcast %20 : f32 to vector<128x128xf32>
    %22 = arith.mulf %21, %17 : vector<128x128xf32>
    %23 = arith.select %19, %17, %22 : vector<128x128xi1>, vector<128x128xf32>
    %24 = arith.mulf %11, %23 : vector<128x128xf32>
    %25 = arith.truncf %24 : vector<128x128xf32> to vector<128x128xbf16>
    %c0_15 = arith.constant 0 : index
    %c0_16 = arith.constant 0 : index
    %26 = vector.load %arg8[%c0_15, %c0_16] : memref<8x128xbf16, #tpu.memory_space<vmem>>, vector<8x128xbf16>
    %cst_17 = arith.constant dense<0.000000e+00> : vector<8x128xf32>
    %27 = tpu.matmul %26, %25, %cst_17 {dimension_numbers = #tpu.dot_dimension_numbers<[1], [1], [0], [0], [0, 0, 1, 0], [], []>} : vector<8x128xbf16>, vector<128x128xbf16>, vector<8x128xf32> -> vector<8x128xf32>
    %c0_18 = arith.constant 0 : index
    %c0_19 = arith.constant 0 : index
    %28 = vector.load %arg9[%c0_18, %c0_19] : memref<8x1xf32, #tpu.memory_space<vmem>>, vector<8x1xf32>
    %29 = vector.broadcast %28 : vector<8x1xf32> to vector<8x128xf32>
    %30 = arith.addf %27, %29 : vector<8x128xf32>
    %c0_20 = arith.constant 0 : index
    %c0_21 = arith.constant 0 : index
    %31 = vector.load %arg10[%c0_20, %c0_21] : memref<8x128xf32, #tpu.memory_space<vmem>>, vector<8x128xf32>
    tpu.vector_store %arg10[%c0_20, %c0_21], %30 {strides = array<i32>} : memref<8x128xf32, #tpu.memory_space<vmem>>, vector<8x128xf32>,
    return
  }
  func.func @transform_0(%arg0: i32) -> i32 {
    %c0_i32 = arith.constant 0 : i32
    %c0_i32_0 = arith.constant 0 : i32
    return %c0_i32 : i32
  }
  func.func @transform_1(%arg0: i32) -> (i32, i32) {
    %c0_i32 = arith.constant 0 : i32
    %c0_i32_0 = arith.constant 0 : i32
    return %arg0, %c0_i32 : i32, i32
  }
  func.func @transform_2(%arg0: i32) -> (i32, i32) {
    %c0_i32 = arith.constant 0 : i32
    %c0_i32_0 = arith.constant 0 : i32
    return %arg0, %c0_i32 : i32, i32
  }
  func.func @transform_3(%arg0: i32) -> (i32, i32) {
    %c0_i32 = arith.constant 0 : i32
    %c0_i32_0 = arith.constant 0 : i32
    %c0_i32_1 = arith.constant 0 : i32
    return %c0_i32, %c0_i32_0 : i32, i32
  }
  func.func @transform_4(%arg0: i32) -> (i32, i32) {
    %c0_i32 = arith.constant 0 : i32
    %c0_i32_0 = arith.constant 0 : i32
    %c0_i32_1 = arith.constant 0 : i32
    return %c0_i32, %c0_i32_0 : i32, i32
  }
  func.func @transform_5(%arg0: i32) -> (i32, i32) {
    %c0_i32 = arith.constant 0 : i32
    %c0_i32_0 = arith.constant 0 : i32
    %c0_i32_1 = arith.constant 0 : i32
    return %c0_i32, %c0_i32_0 : i32, i32
  }
  func.func @transform_6(%arg0: i32) -> (i32, i32) {
    %c0_i32 = arith.constant 0 : i32
    %c0_i32_0 = arith.constant 0 : i32
    %c0_i32_1 = arith.constant 0 : i32
    return %c0_i32, %c0_i32_0 : i32, i32
  }
  func.func @transform_7(%arg0: i32) -> (i32, i32) {
    %c0_i32 = arith.constant 0 : i32
    %c0_i32_0 = arith.constant 0 : i32
    %c0_i32_1 = arith.constant 0 : i32
    return %c0_i32, %c0_i32_0 : i32, i32
  }
  func.func @transform_8(%arg0: i32) -> (i32, i32) {
    %c0_i32 = arith.constant 0 : i32
    %c0_i32_0 = arith.constant 0 : i32
    %c0_i32_1 = arith.constant 0 : i32
    return %c0_i32, %c0_i32_0 : i32, i32
  }
  func.func @transform_9(%arg0: i32) -> (i32, i32) {
    %c0_i32 = arith.constant 0 : i32
    %c0_i32_0 = arith.constant 0 : i32
    return %c0_i32, %arg0 : i32, i32
  }
}

</mosaic_0001>

<bundles_post_ra>
// kernel: tpu_custom_call.1
= control target key start
LH: loop header
LB: loop body
LE: loop exit
PB: predicated region body
PF: predicated region fallthrough
CT: control target
= control target key end

     0   :  { %14 = vsyncpa [#allocation4], 0  ;;  %s939_s0 = inlined_call_operand.vmem [shape: f32[2], index: 0, kind: input, shape index: {}]   ;;  %s940_s1 = inlined_call_operand.vmem [shape: bf16[128,32], index: 1, kind: input, shape index: {}]   ;;  %s941_s2 = inlined_call_operand.vmem [shape: bf16[128,32], index: 2, kind: input, shape index: {}]   ;;  %s942_s3 = inlined_call_operand.vmem [shape: bf16[32,128], index: 3, kind: input, shape index: {}]   ;;  %s943_s4 = inlined_call_operand.vmem [shape: f32[1,128], index: 4, kind: input, shape index: {}]   ;;  %s944_s5 = inlined_call_operand.vmem [shape: bf16[32,128], index: 5, kind: input, shape index: {}]   ;;  %s945_s6 = inlined_call_operand.vmem [shape: f32[1,128], index: 6, kind: input, shape index: {}]   ;;  %s946_s7 = inlined_call_operand.vmem [shape: bf16[8,128], index: 7, kind: input, shape index: {}]   ;;  %s947_s8 = inlined_call_operand.vmem [shape: f32[8,1], index: 8, kind: input, shape index: {}]   ;;  %s948_s9 = inlined_call_operand.hbm [shape: f32[8,128], index: 9, kind: output, shape index: {}]  }
   0x1   :  { %15 = vsyncpa [#allocation3], 0  ;;  %s21_s11 = sshll.u32 %s939_s0, 4  ;;  %s675_s12 = smov [#allocation2]   ;;  %s22_s11 = int_to_ptr.vmem [resolvable:$true] %s21_s11 }
   0x2   :  { %24 = dma.vmem_to_smem %s22_s11, 16, %s675_s12, [#allocation4]  }
   0x3   :  { %671 = dma.done.wait [#allocation4], 16  }
   0x4   :  { %672 = vsyncadd [#allocation4], 4294967280 }
   0x5   :  { %45 = sfence }
   0x6   :  { %v614_v0 = vld [vmem:[%s942_s3 + $0x8] sm:$0xff]  ;;  %v613_v2 = vld [vmem:[%s942_s3] sm:$0xff]  ;;  %v611_v5 = vld [vmem:[%s940_s1 + $0x30] sm:$0xff]  ;;  %vm123_vm0 = vcmask 261120   ;;  %s213_s26 = sld [smem:[#allocation2]]  ;;  %s498_s14 = sshll.u32 %s948_s9, 4  ;;  %s499_s14 = int_to_ptr.hbm [resolvable:$true] %s498_s14 }
   0x7   :  { %v624_v1 = vld [vmem:[%s944_s5 + $0x8] sm:$0xff]  ;;  %154 = vmatpush.bf16.msra.mxu0 %v614_v0  ;;  %625 = vmatpush.bf16.msra.mxu3 %v614_v0  ;;  %v623_v3 = vld [vmem:[%s944_s5] sm:$0xff]  ;;  %v612_v8 = vld [vmem:[%s940_s1 + $0x38] sm:$0xff]  ;;  %s604_s27 = sld [smem:[#allocation2 + $0x1]] }
   0x8   :  { %353 = vmatpush.bf16.msra.mxu1 %v624_v1  ;;  %v605_v4 = vld [vmem:[%s940_s1] sm:$0xff]  ;;  %v606_v7 = vld [vmem:[%s940_s1 + $0x8] sm:$0xff]  ;;  %v607_v10 = vld [vmem:[%s940_s1 + $0x10] sm:$0xff] }
   0x9   :  { %v615_v6 = vld [vmem:[%s941_s2] sm:$0xff]  ;;  %v616_v9 = vld [vmem:[%s941_s2 + $0x8] sm:$0xff]  ;;  %v621_v11 = vld [vmem:[%s941_s2 + $0x30] sm:$0xff] }
   0xa   :  { %v617_v12 = vld [vmem:[%s941_s2 + $0x10] sm:$0xff]  ;;  %v608_v13 = vld [vmem:[%s940_s1 + $0x18] sm:$0xff]  ;;  %v609_v16 = vld [vmem:[%s940_s1 + $0x20] sm:$0xff] }
   0xb   :  { %155 = vmatpush.bf16.msra.mxu0 %v613_v2  ;;  %626 = vmatpush.bf16.msra.mxu3 %v613_v2  ;;  %v622_v14 = vld [vmem:[%s941_s2 + $0x38] sm:$0xff]  ;;  %v619_v17 = vld [vmem:[%s941_s2 + $0x20] sm:$0xff]  ;;  %v610_v18 = vld [vmem:[%s940_s1 + $0x28] sm:$0xff] }
   0xc   :  { %354 = vmatpush.bf16.msra.mxu1 %v623_v3  ;;  %v618_v15 = vld [vmem:[%s941_s2 + $0x18] sm:$0xff]  ;;  %v620_v19 = vld [vmem:[%s941_s2 + $0x28] sm:$0xff]  ;;  %v810_v20 = vld [vmem:[%s943_s4] ss:$0 sm:$0xff]  ;;  %v817_v23 = vstv %s213_s26 }
   0xd   :  { %v815_v21 = vld [vmem:[%s945_s6] ss:$0 sm:$0xff]  ;;  %v820_v26 = vstv %s604_s27 }
   0xe   :  { %548 = vmatmul.msk.bf16.vlgmr.msra.gmra.mxu0 %vm123_vm0, %v605_v4  ;;  %554 = vmatmul.msk.bf16.vlgmr.msra.gmra.mxu3 %vm123_vm0, %v611_v5 }
   0xf   :  { %627 = vmatpush.bf16.msrb.mxu3 %v624_v1  ;;  %596 = vmatmul.msk.bf16.vlgmr.msra.gmra.mxu1 %vm123_vm0, %v615_v6 }
  0x13   :  { %628 = vmatpush.bf16.msrb.mxu3 %v623_v3 }
  0x1e   :  { %549 = vmatmul.msk.bf16.gmra.mxu0 %vm123_vm0, %v606_v7  ;;  %555 = vmatmul.msk.bf16.gmra.mxu3 %vm123_vm0, %v612_v8 }
  0x1f   :  { %597 = vmatmul.msk.bf16.gmra.mxu1 %vm123_vm0, %v616_v9 }
  0x2e   :  { %550 = vmatmul.msk.bf16.gmra.mxu0 %vm123_vm0, %v607_v10  ;;  %602 = vmatmul.msk.bf16.vlgmr.msrb.gmra.mxu3 %vm123_vm0, %v621_v11 }
  0x2f   :  { %598 = vmatmul.msk.bf16.gmra.mxu1 %vm123_vm0, %v617_v12 }
  0x3e   :  { %551 = vmatmul.msk.bf16.gmra.mxu0 %vm123_vm0, %v608_v13  ;;  %603 = vmatmul.msk.bf16.gmra.mxu3 %vm123_vm0, %v622_v14 }
  0x3f   :  { %599 = vmatmul.msk.bf16.gmra.mxu1 %vm123_vm0, %v618_v15 }
  0x4e   :  { %552 = vmatmul.msk.bf16.gmra.mxu0 %vm123_vm0, %v609_v16 }
  0x4f   :  { %600 = vmatmul.msk.bf16.gmra.mxu1 %vm123_vm0, %v619_v17 }
  0x5e   :  { %553 = vmatmul.msk.bf16.gmra.mxu0 %vm123_vm0, %v610_v18 }
  0x5f   :  { %601 = vmatmul.msk.bf16.gmra.mxu1 %vm123_vm0, %v620_v19 }
  0x8b   :  { %v157_v22 = vpop.f32.mrf.mxu0 }
  0x8c   :  { %v158_v24 = vadd.f32 %v810_v20, %v157_v22  ;;  %v356_v25 = vpop.f32.mrf.mxu1 }
  0x8d   :  { %v357_v27 = vadd.f32 %v815_v21, %v356_v25 }
  0x8e   :  { %vm197_vm1 = vcmp.ge.f32.partialorder %v158_v24, 0.0  ;;  %v215_v28 = vmul.f32 %v817_v23, %v158_v24 }
  0x8f   :  { %vm396_vm2 = vcmp.ge.f32.partialorder %v357_v27, 0.0  ;;  %v414_v29 = vmul.f32 %v820_v26, %v357_v27 }
  0x90   :  { %v231_v30 = vsel %vm197_vm1, %v158_v24, %v215_v28 }
  0x91   :  { %v825_v31 = vpop.f32.mrf.mxu3  ;;  %v430_v32 = vsel %vm396_vm2, %v357_v27, %v414_v29 }
  0x92   :  { %v827_v33 = vmul.f32 %v430_v32, %v231_v30 }
  0x93   :  { %v159_v34 = vpop.f32.mrf.mxu0 }
  0x94   :  { %v160_v35 = vadd.f32 %v810_v20, %v159_v34  ;;  %v358_v36 = vpop.f32.mrf.mxu1 }
  0x95   :  { %v359_v37 = vadd.f32 %v815_v21, %v358_v36 }
  0x96   :  { %vm198_vm3 = vcmp.ge.f32.partialorder %v160_v35, 0.0  ;;  %v216_v38 = vmul.f32 %v817_v23, %v160_v35 }
  0x97   :  { %vm397_vm4 = vcmp.ge.f32.partialorder %v359_v37, 0.0  ;;  %v415_v39 = vmul.f32 %v820_v26, %v359_v37 }
  0x98   :  { %v232_v40 = vsel %vm198_vm3, %v160_v35, %v216_v38 }
  0x99   :  { %v833_v41 = vpop.f32.mrf.mxu3  ;;  %v431_v42 = vsel %vm397_vm4, %v359_v37, %v415_v39 }
  0x9a   :  { %v835_v43 = vmul.f32 %v431_v42, %v232_v40 }
  0x9b   :  { %v162_v44 = vpop.f32.mrf.mxu0 }
  0x9c   :  { %v163_v45 = vadd.f32 %v810_v20, %v162_v44  ;;  %v361_v46 = vpop.f32.mrf.mxu1  ;;  %v462_v47 = vpack.c.bf16 %v835_v43, %v827_v33 }
  0x9d   :  { %v362_v48 = vadd.f32 %v815_v21, %v361_v46 }
  0x9e   :  { %vm199_vm5 = vcmp.ge.f32.partialorder %v163_v45, 0.0  ;;  %v217_v49 = vmul.f32 %v817_v23, %v163_v45 }
  0x9f   :  { %vm398_vm6 = vcmp.ge.f32.partialorder %v362_v48, 0.0  ;;  %v416_v50 = vmul.f32 %v820_v26, %v362_v48 }
  0xa0   :  { %v233_v51 = vsel %vm199_vm5, %v163_v45, %v217_v49  ;;  %v190_v45 = vadd.f32 %v810_v20, %v833_v41 }
  0xa1   :  { %v192_v52 = vpop.f32.mrf.mxu3  ;;  %v432_v53 = vsel %vm398_vm6, %v362_v48, %v416_v50 }
  0xa2   :  { %v843_v54 = vmul.f32 %v432_v53, %v233_v51  ;;  %v193_v35 = vadd.f32 %v810_v20, %v192_v52  ;;  %v188_v52 = vadd.f32 %v810_v20, %v825_v31  ;;  %vm210_vm2 = vcmp.ge.f32.partialorder %v190_v45, 0.0 }
  0xa3   :  { %v164_v55 = vpop.f32.mrf.mxu0 }
  0xa4   :  { %v165_v56 = vadd.f32 %v810_v20, %v164_v55  ;;  %v363_v57 = vpop.f32.mrf.mxu1  ;;  %v229_v39 = vmul.f32 %v817_v23, %v193_v35  ;;  %vm211_vm14 = vcmp.ge.f32.partialorder %v193_v35, 0.0  ;;  %vm209_vm4 = vcmp.ge.f32.partialorder %v188_v52, 0.0 }
  0xa5   :  { %v364_v58 = vadd.f32 %v815_v21, %v363_v57 }
  0xa6   :  { %vm200_vm7 = vcmp.ge.f32.partialorder %v165_v56, 0.0  ;;  %v218_v59 = vmul.f32 %v817_v23, %v165_v56  ;;  %v245_v55 = vsel %vm211_vm14, %v193_v35, %v229_v39 }
  0xa7   :  { %vm399_vm8 = vcmp.ge.f32.partialorder %v364_v58, 0.0  ;;  %v417_v60 = vmul.f32 %v820_v26, %v364_v58 }
  0xa8   :  { %v234_v61 = vsel %vm200_vm7, %v165_v56, %v218_v59  ;;  %v228_v59 = vmul.f32 %v817_v23, %v190_v45 }
  0xa9   :  { %v194_v62 = vpop.f32.mrf.mxu3  ;;  %v433_v63 = vsel %vm399_vm8, %v364_v58, %v417_v60 }
  0xaa   :  { %v849_v0 = vmul.f32 %v433_v63, %v234_v61  ;;  %v195_v36 = vadd.f32 %v810_v20, %v194_v62  ;;  %v227_v62 = vmul.f32 %v817_v23, %v188_v52 }
  0xab   :  { %v167_v1 = vpop.f32.mrf.mxu0 }
  0xac   :  { %v168_v2 = vadd.f32 %v810_v20, %v167_v1  ;;  %v366_v3 = vpop.f32.mrf.mxu1  ;;  %v463_v4 = vpack.c.bf16 %v849_v0, %v843_v54  ;;  %v230_v40 = vmul.f32 %v817_v23, %v195_v36  ;;  %vm212_vm15 = vcmp.ge.f32.partialorder %v195_v36, 0.0 }
  0xad   :  { %v367_v5 = vadd.f32 %v815_v21, %v366_v3 }
  0xae   :  { %vm201_vm9 = vcmp.ge.f32.partialorder %v168_v2, 0.0  ;;  %v219_v6 = vmul.f32 %v817_v23, %v168_v2  ;;  %v246_v56 = vsel %vm212_vm15, %v195_v36, %v230_v40 }
  0xaf   :  { %vm400_vm10 = vcmp.ge.f32.partialorder %v367_v5, 0.0  ;;  %v418_v7 = vmul.f32 %v820_v26, %v367_v5 }
  0xb0   :  { %v235_v8 = vsel %vm201_vm9, %v168_v2, %v219_v6  ;;  %v244_v2 = vsel %vm210_vm2, %v190_v45, %v228_v59  ;;  %v243_v6 = vsel %vm209_vm4, %v188_v52, %v227_v62 }
  0xb1   :  { %v386_v9 = vpop.f32.mrf.mxu3  ;;  %v434_v10 = vsel %vm400_vm10, %v367_v5, %v418_v7 }
  0xb2   :  { %v857_v11 = vmul.f32 %v434_v10, %v235_v8  ;;  %v387_v48 = vadd.f32 %v815_v21, %v386_v9 }
  0xb3   :  { %v169_v12 = vpop.f32.mrf.mxu0 }
  0xb4   :  { %v170_v13 = vadd.f32 %v810_v20, %v169_v12  ;;  %v368_v14 = vpop.f32.mrf.mxu1  ;;  %v426_v60 = vmul.f32 %v820_v26, %v387_v48  ;;  %vm408_vm3 = vcmp.ge.f32.partialorder %v387_v48, 0.0 }
  0xb5   :  { %v369_v15 = vadd.f32 %v815_v21, %v368_v14 }
  0xb6   :  { %vm202_vm11 = vcmp.ge.f32.partialorder %v170_v13, 0.0  ;;  %v220_v16 = vmul.f32 %v817_v23, %v170_v13  ;;  %v442_v3 = vsel %vm408_vm3, %v387_v48, %v426_v60 }
  0xb7   :  { %vm401_vm12 = vcmp.ge.f32.partialorder %v369_v15, 0.0  ;;  %v419_v17 = vmul.f32 %v820_v26, %v369_v15  ;;  %v458_v7 = vmul.f32 %v442_v3, %v243_v6  ;;  %v676_v6 = vmov 0  }
  0xb8   :  { %v236_v18 = vsel %vm202_vm11, %v170_v13, %v220_v16  ;;  %632 = vset.pattern.permute.xlu0 %v676_v6 }
  0xb9   :  { %v388_v19 = vpop.f32.mrf.mxu3  ;;  %v435_v22 = vsel %vm401_vm12, %v369_v15, %v419_v17 }
  0xba   :  { %v863_v24 = vmul.f32 %v435_v22, %v236_v18  ;;  %v389_v42 = vadd.f32 %v815_v21, %v388_v19 }
  0xbb   :  { %v865_v25 = vpop.f32.mrf.mxu0 }
  0xbc   :  { %v867_v27 = vpop.f32.mrf.mxu1  ;;  %v464_v28 = vpack.c.bf16 %v863_v24, %v857_v11  ;;  %v427_v53 = vmul.f32 %v820_v26, %v389_v42  ;;  %vm409_vm1 = vcmp.ge.f32.partialorder %v389_v42, 0.0 }
  0xbe   :  { %v443_v63 = vsel %vm409_vm1, %v389_v42, %v427_v53 }
  0xbf   :  { %v459_v5 = vmul.f32 %v443_v63, %v244_v2 }
  0xc1   :  { %v391_v29 = vpop.f32.mrf.mxu3  ;;  %v468_v8 = vpack.c.bf16 %v459_v5, %v458_v7  ;;  %v471_v5 = vld [vmem:[%s947_s8] sm:$0xff]  ;;  %s677_s8 = smov [#allocation5]  }
  0xc2   :  { %v392_v32 = vadd.f32 %v815_v21, %v391_v29  ;;  %474 = vperm.xlu0 %632, %v471_v5   ;;  %s496_s11 = sshll.u32 %s677_s8, 4  ;;  %s497_s11 = int_to_ptr.vmem [resolvable:$true] %s496_s11 }
  0xc3   :  { %v871_v30 = vpop.f32.mrf.mxu0 }
  0xc4   :  { %v874_v34 = vpop.f32.mrf.mxu1  ;;  %v428_v37 = vmul.f32 %v820_v26, %v392_v32  ;;  %vm410_vm13 = vcmp.ge.f32.partialorder %v392_v32, 0.0  ;;  %v175_v52 = vadd.f32 %v810_v20, %v871_v30 }
  0xc5   :  { %v374_v53 = vadd.f32 %v815_v21, %v874_v34 }
  0xc6   :  { %v444_v51 = vsel %vm410_vm13, %v392_v32, %v428_v37  ;;  %vm204_vm13 = vcmp.ge.f32.partialorder %v175_v52, 0.0 }
  0xc7   :  { %v460_v41 = vmul.f32 %v444_v51, %v245_v55  ;;  %v421_v62 = vmul.f32 %v820_v26, %v374_v53  ;;  %vm403_vm14 = vcmp.ge.f32.partialorder %v374_v53, 0.0 }
  0xc9   :  { %v393_v38 = vpop.f32.mrf.mxu3 }
  0xca   :  { %v394_v44 = vadd.f32 %v815_v21, %v393_v38 }
  0xcb   :  { %v177_v46 = vpop.f32.mrf.mxu0 }
  0xcc   :  { %vm411_vm0 = vcmp.ge.f32.partialorder %v394_v44, 0.0  ;;  %v429_v49 = vmul.f32 %v820_v26, %v394_v44  ;;  %v376_v50 = vpop.f32.mrf.mxu1  ;;  %v178_v32 = vadd.f32 %v810_v20, %v177_v46 }
  0xcd   :  { %v377_v35 = vadd.f32 %v815_v21, %v376_v50 }
  0xce   :  { %v445_v57 = vsel %vm411_vm0, %v394_v44, %v429_v49  ;;  %v223_v49 = vmul.f32 %v817_v23, %v178_v32  ;;  %vm205_vm11 = vcmp.ge.f32.partialorder %v178_v32, 0.0 }
  0xcf   :  { %v461_v58 = vmul.f32 %v445_v57, %v246_v56  ;;  %v422_v50 = vmul.f32 %v820_v26, %v377_v35  ;;  %vm404_vm12 = vcmp.ge.f32.partialorder %v377_v35, 0.0  ;;  %v173_v57 = vadd.f32 %v810_v20, %v865_v25 }
  0xd1   :  { %v469_v61 = vpack.c.bf16 %v461_v58, %v460_v41  ;;  %v372_v41 = vadd.f32 %v815_v21, %v867_v27  ;;  %v239_v58 = vsel %vm205_vm11, %v178_v32, %v223_v49  ;;  %v438_v59 = vsel %vm404_vm12, %v377_v35, %v422_v50 }
  0xd2   :  { %v454_v30 = vmul.f32 %v438_v59, %v239_v58  ;;  %v221_v34 = vmul.f32 %v817_v23, %v173_v57  ;;  %vm203_vm15 = vcmp.ge.f32.partialorder %v173_v57, 0.0 }
  0xd3   :  { %v179_v31 = vpop.f32.mrf.mxu0  ;;  %477 = vmatpush.bf16.xpose.msra.mxu2 %v469_v61  ;;  %v222_v61 = vmul.f32 %v817_v23, %v175_v52  ;;  %v420_v63 = vmul.f32 %v820_v26, %v372_v41  ;;  %vm402_vm0 = vcmp.ge.f32.partialorder %v372_v41, 0.0 }
  0xd4   :  { %v378_v1 = vpop.f32.mrf.mxu1  ;;  %v180_v19 = vadd.f32 %v810_v20, %v179_v31  ;;  %v437_v31 = vsel %vm403_vm14, %v374_v53, %v421_v62 }
  0xd5   :  { %v379_v22 = vadd.f32 %v815_v21, %v378_v1  ;;  %v238_v25 = vsel %vm204_vm13, %v175_v52, %v222_v61  ;;  %v436_v27 = vsel %vm402_vm0, %v372_v41, %v420_v63 }
  0xd6   :  { %v224_v42 = vmul.f32 %v817_v23, %v180_v19  ;;  %vm206_vm9 = vcmp.ge.f32.partialorder %v180_v19, 0.0  ;;  %v453_v1 = vmul.f32 %v437_v31, %v238_v25 }
  0xd7   :  { %v423_v44 = vmul.f32 %v820_v26, %v379_v22  ;;  %vm405_vm10 = vcmp.ge.f32.partialorder %v379_v22, 0.0 }
  0xd8   :  { %v240_v55 = vsel %vm206_vm9, %v180_v19, %v224_v42 }
  0xd9   :  { %v439_v56 = vsel %vm405_vm10, %v379_v22, %v423_v44 }
  0xda   :  { %v455_v60 = vmul.f32 %v439_v56, %v240_v55 }
  0xdb   :  { %v182_v9 = vpop.f32.mrf.mxu0  ;;  %478 = vmatpush.bf16.xpose.msra.mxu2 %v468_v8 }
  0xdc   :  { %v381_v10 = vpop.f32.mrf.mxu1  ;;  %v183_v12 = vadd.f32 %v810_v20, %v182_v9 }
  0xdd   :  { %v382_v13 = vadd.f32 %v815_v21, %v381_v10 }
  0xde   :  { %v225_v14 = vmul.f32 %v817_v23, %v183_v12  ;;  %vm207_vm5 = vcmp.ge.f32.partialorder %v183_v12, 0.0 }
  0xdf   :  { %v424_v15 = vmul.f32 %v820_v26, %v382_v13  ;;  %vm406_vm6 = vcmp.ge.f32.partialorder %v382_v13, 0.0 }
  0xe0   :  { %v241_v38 = vsel %vm207_vm5, %v183_v12, %v225_v14 }
  0xe1   :  { %v440_v39 = vsel %vm406_vm6, %v382_v13, %v424_v15 }
  0xe2   :  { %v456_v48 = vmul.f32 %v440_v39, %v241_v38 }
  0xe3   :  { %v184_v16 = vpop.f32.mrf.mxu0 }
  0xe4   :  { %v185_v17 = vadd.f32 %v810_v20, %v184_v16  ;;  %v383_v18 = vpop.f32.mrf.mxu1  ;;  %v466_v20 = vpack.c.bf16 %v455_v60, %v454_v30 }
  0xe5   :  { %v384_v29 = vadd.f32 %v815_v21, %v383_v18  ;;  %v237_v21 = vsel %vm203_vm15, %v173_v57, %v221_v34 }
  0xe6   :  { %vm208_vm7 = vcmp.ge.f32.partialorder %v185_v17, 0.0  ;;  %v226_v36 = vmul.f32 %v817_v23, %v185_v17  ;;  %v452_v2 = vmul.f32 %v436_v27, %v237_v21  ;;  %v470_v23 = vld [vmem:[%s946_s7] sm:$0xf] }
  0xe7   :  { %vm407_vm8 = vcmp.ge.f32.partialorder %v384_v29, 0.0  ;;  %v425_v37 = vmul.f32 %v820_v26, %v384_v29 }
  0xe8   :  { %v242_v40 = vsel %vm208_vm7, %v185_v17, %v226_v36  ;;  %v465_v3 = vpack.c.bf16 %v453_v1, %v452_v2 }
  0xe9   :  { %v441_v45 = vsel %vm407_vm8, %v384_v29, %v425_v37 }
  0xea   :  { %v457_v46 = vmul.f32 %v441_v45, %v242_v40 }
  0xec   :  { %v467_v51 = vpack.c.bf16 %v457_v46, %v456_v48 }
  0xee   :  { %479 = vmatpush.bf16.xpose.msra.mxu2 %v467_v51 }
  0xf6   :  { %480 = vmatpush.bf16.xpose.msra.mxu2 %v466_v20 }
  0xfe   :  { %481 = vmatpush.bf16.xpose.msra.mxu2 %v465_v3 }
 0x106   :  { %482 = vmatpush.bf16.xpose.msra.mxu2 %v464_v28 }
 0x10e   :  { %483 = vmatpush.bf16.xpose.msra.mxu2 %v463_v4 }
 0x116   :  { %484 = vmatpush.bf16.xpose.msra.mxu2 %v462_v47 }
 0x11d   :  { %485 = vmatmul.bf16.vlgmr.msra.gmra.mxu2 %v470_v23 }
 0x134   :  { %v475_v26 = vpop.permute.xlu0 %474 }
 0x1a0   :  { %v486_v11 = vpop.f32.mrf.mxu2 }
 0x1a1   :  { %v487_v24 = vadd.f32 %v486_v11, %v475_v26 }
 0x1a3   :  { %490 = vst [vmem:[#allocation5] sm:$0xff] %v487_v24 }
 0x1a4   :  { %501 = dma.vmem_to_hbm [thread:$0]  %s497_s11, 128, %s499_s14, [#allocation3]  }
 0x1a8   :  { %v488_v33 = vpop.f32.mrf.mxu2 }
 0x1a9   :  { %673 = dma.done.wait [#allocation3], 128  }
 0x1aa   :  { %674 = vsyncadd [#allocation3], 4294967168 }
 0x1ab   :  { %506 = vsyncpa [#allocation3], 1 }
 0x1ac   :  { %507 = vsyncpa [#allocation4], 1 }

</bundles_post_ra>
